<compile_context>
chip_gen: v5e
topology: v5e:2x2
jax: 0.10.0
libtpu: 0.0.40
codegen_flags: <defaults>
</compile_context>

<pallas_src>
import math

import jax
import jax.numpy as jnp
from jax.experimental import pallas as pl
from jax.experimental.pallas import tpu as pltpu


def _round_up(x, m):
    return ((x + m - 1) // m) * m


def _cdiv(a, b):
    return -(-a // b)


def _pick_tile(dim, tile_max, align):
    """Balanced tiling: waste at most one `align`-sized sliver of padding."""
    n_tiles = max(1, _cdiv(dim, tile_max))
    tile = _round_up(_cdiv(dim, n_tiles), align)
    return tile, n_tiles, n_tiles * tile


# ----------------------------------------------------------------------------
# Kernels.  Weight tile arrives in native (tn, tk) layout; contraction is
# x(tm,tk) . w(tn,tk)^T on the MXU via dot_general (trans_b).
# ----------------------------------------------------------------------------
def _partial_dot(x_ref, w_ref):
    return jax.lax.dot_general(
        x_ref[...], w_ref[...],
        dimension_numbers=(((1,), (1,)), ((), ())),
        preferred_element_type=jnp.float32)


def _kernel_single_k_bias(x_ref, w_ref, b_ref, o_ref):
    o_ref[...] = (_partial_dot(x_ref, w_ref) + b_ref[...]).astype(o_ref.dtype)


def _kernel_single_k_nobias(x_ref, w_ref, o_ref):
    o_ref[...] = _partial_dot(x_ref, w_ref).astype(o_ref.dtype)


def _kernel_multi_k_bias(x_ref, w_ref, b_ref, o_ref, acc_ref):
    k = pl.program_id(2)
    nk = pl.num_programs(2)
    part = _partial_dot(x_ref, w_ref)

    @pl.when(k == 0)
    def _():
        acc_ref[...] = part

    @pl.when(jnp.logical_and(k > 0, k < nk - 1))
    def _():
        acc_ref[...] += part

    # Fuse the last partial product + f32 bias directly into the store.
    @pl.when(k == nk - 1)
    def _():
        o_ref[...] = (acc_ref[...] + part + b_ref[...]).astype(o_ref.dtype)


def _kernel_multi_k_nobias(x_ref, w_ref, o_ref, acc_ref):
    k = pl.program_id(2)
    nk = pl.num_programs(2)
    part = _partial_dot(x_ref, w_ref)

    @pl.when(k == 0)
    def _():
        acc_ref[...] = part

    @pl.when(jnp.logical_and(k > 0, k < nk - 1))
    def _():
        acc_ref[...] += part

    @pl.when(k == nk - 1)
    def _():
        o_ref[...] = (acc_ref[...] + part).astype(o_ref.dtype)


# ----------------------------------------------------------------------------
# GEMM wrapper: balanced padding to TPU-friendly shapes, kernel selection,
# VMEM budgeting, launch.
# ----------------------------------------------------------------------------
def _linear_gemm(x2, weight, bias_row, *, out_dtype=None, compute_dtype=None,
                 tm_max=512, tn_max=512, tk_max=1024):
    """x2: (M, K); weight: (N, K) native PyTorch layout; bias_row: (1, N) f32 or None."""
    M, K = x2.shape
    N, Kw = weight.shape
    assert Kw == K, (Kw, K)

    out_dtype = x2.dtype if out_dtype is None else jnp.dtype(out_dtype)
    compute_dtype = x2.dtype if compute_dtype is None else jnp.dtype(compute_dtype)
    cbytes = jnp.dtype(compute_dtype).itemsize
    obytes = jnp.dtype(out_dtype).itemsize
    # Sublane alignment for the M axis scales with operand packing (8/16/32).
    m_align = 8 * max(1, 4 // cbytes)

    tm, m_tiles, Mp = _pick_tile(M, tm_max, m_align)
    tn, n_tiles, Np = _pick_tile(N, tn_max, 128)   # lane-dense output
    tk, k_tiles, Kp = _pick_tile(K, tk_max, 128)   # aligned MXU contraction

    # v7x megacore: make sure the parallel grid axes expose >= 2 blocks.
    if m_tiles == 1 and n_tiles == 1 and Np >= 256:
        n_tiles = 2
        tn = _round_up(_cdiv(Np, 2), 128)
        Np = n_tiles * tn

    # Cast operands to the compute dtype first (halves pad + DMA bytes for bf16),
    # then zero-pad.  K padding is required for correctness of the K reduction.
    x_p = x2.astype(compute_dtype)
    w_p = weight.astype(compute_dtype)
    if (Mp, Kp) != (M, K):
        x_p = jnp.pad(x_p, ((0, Mp - M), (0, Kp - K)))
    if (Np, Kp) != (N, K):
        w_p = jnp.pad(w_p, ((0, Np - N), (0, Kp - K)))

    operands = [x_p, w_p]
    in_specs = [
        pl.BlockSpec((tm, tk), lambda i, j, k: (i, k)),   # activations
        pl.BlockSpec((tn, tk), lambda i, j, k: (j, k)),   # weight, native (N, K)
    ]

    has_bias = bias_row is not None
    if has_bias:
        b_p = bias_row.astype(jnp.float32)                # keep bias in f32
        if Np != N:
            b_p = jnp.pad(b_p, ((0, 0), (0, Np - N)))
        operands.append(b_p)
        in_specs.append(pl.BlockSpec((1, tn), lambda i, j, k: (0, j)))

    multi_k = k_tiles > 1
    if has_bias:
        kernel = _kernel_multi_k_bias if multi_k else _kernel_single_k_bias
    else:
        kernel = _kernel_multi_k_nobias if multi_k else _kernel_single_k_nobias

    scratch_shapes = [pltpu.VMEM((tm, tn), jnp.float32)] if multi_k else []

    # Explicit VMEM budget: double-buffered x/w/out tiles + acc + bias, with
    # headroom; stays within v5e's small scoped default and v7x's 64 MiB VMEM.
    footprint = (2 * (tm * tk + tn * tk) * cbytes
                 + 2 * tm * tn * obytes
                 + (tm * tn * 4 if multi_k else 0)
                 + (2 * tn * 4 if has_bias else 0))
    vmem_limit = min(max(int(footprint * 1.5) + (4 << 20), 32 << 20), 48 << 20)

    cost = pl.CostEstimate(
        flops=2 * Mp * Np * Kp,
        transcendentals=0,
        bytes_accessed=int(Mp * Kp * cbytes * n_tiles
                           + Np * Kp * cbytes * m_tiles
                           + Mp * Np * obytes
                           + (Np * 4 if has_bias else 0)),
    )

    out = pl.pallas_call(
        kernel,
        out_shape=jax.ShapeDtypeStruct((Mp, Np), out_dtype),
        grid_spec=pltpu.PrefetchScalarGridSpec(
            num_scalar_prefetch=0,
            grid=(m_tiles, n_tiles, k_tiles),
            in_specs=in_specs,
            out_specs=pl.BlockSpec((tm, tn), lambda i, j, k: (i, j)),
            scratch_shapes=scratch_shapes,
        ),
        compiler_params=pltpu.CompilerParams(
            dimension_semantics=("parallel", "parallel", "arbitrary"),
            vmem_limit_bytes=vmem_limit,
        ),
        cost_estimate=cost,
    )(*operands)

    if (Mp, Np) != (M, N):
        out = out[:M, :N]
    return out


# ----------------------------------------------------------------------------
# MetaLinear.forward equivalent:  y = F.linear(x, weight, bias)
# ----------------------------------------------------------------------------
def meta_linear_forward(x, weight, bias=None, *, compute_dtype=None):
    """x: (..., K); weight: (N, K) (PyTorch layout); bias: (N,) or None.

    compute_dtype: optional MXU operand dtype (e.g. jnp.bfloat16 on v6e/v7x);
    accumulation and bias add stay in f32, output keeps x.dtype.
    """
    K = x.shape[-1]
    N = weight.shape[0]
    lead = x.shape[:-1]

    x2 = x.reshape(-1, K)
    bias_row = None if bias is None else bias.reshape(1, N).astype(jnp.float32)

    out = _linear_gemm(x2, weight, bias_row,
                       out_dtype=x.dtype, compute_dtype=compute_dtype)
    return out.reshape(lead + (N,))

# TODO(synk): MetaModule.named_params/update_params/set_param/copy are host-side
# meta-learning bookkeeping with no device kernel; not lowered here.


# ----------------------------------------------------------------------------
# Main: deterministic params, small shapes, correctness checks vs plain JAX
# ----------------------------------------------------------------------------
if __name__ == "__main__":
    key = jax.random.PRNGKey(0)
    k_x, k_w, k_b = jax.random.split(key, 3)

    # MetaLinear(32, 64) applied to a (batch=2, seq=8, 32) input.
    B, T, IN, OUT = 2, 8, 32, 64
    x = jax.random.normal(k_x, (B, T, IN), dtype=jnp.float32)

    # Deterministic init mimicking nn.Linear's default kaiming-uniform bound.
    bound = 1.0 / math.sqrt(IN)
    weight = jax.random.uniform(k_w, (OUT, IN), jnp.float32, -bound, bound)
    bias = jax.random.uniform(k_b, (OUT,), jnp.float32, -bound, bound)

    ref = jnp.einsum("btk,nk->btn", x, weight) + bias
    ref_nb = jnp.einsum("btk,nk->btn", x, weight)

    # 1) f32 path (single-K-step kernel, fused bias).
    fwd = jax.jit(meta_linear_forward)
    out = jax.block_until_ready(fwd(x, weight, bias))
    assert out.shape == (B, T, OUT), out.shape
    assert jnp.allclose(out, ref, atol=1e-5, rtol=1e-5), float(
        jnp.max(jnp.abs(out - ref)))

    # 2) bias=None path (bias-free kernel variant).
    fwd_nb = jax.jit(lambda a, w: meta_linear_forward(a, w, None))
    out_nb = jax.block_until_ready(fwd_nb(x, weight))
    assert jnp.allclose(out_nb, ref_nb, atol=1e-5, rtol=1e-5)

    # 3) bf16 MXU-operand path (f32 accumulation), looser tolerance.
    fwd_bf16 = jax.jit(
        lambda a, w, b: meta_linear_forward(a, w, b, compute_dtype=jnp.bfloat16))
    out_bf16 = jax.block_until_ready(fwd_bf16(x, weight, bias))
    assert jnp.allclose(out_bf16, ref, atol=1e-1, rtol=1e-1)

    # 4) Exercise the multi-K-step (grid K reduction) kernel and the megacore
    #    N-split at small shapes by capping tk at 128.
    M2, K2, N2 = 32, 384, 256
    x2 = jax.random.normal(k_x, (M2, K2), jnp.float32)
    w2 = jax.random.normal(k_w, (N2, K2), jnp.float32) * 0.05
    b2 = jax.random.normal(k_b, (N2,), jnp.float32)
    out2 = jax.block_until_ready(
        _linear_gemm(x2, w2, b2.reshape(1, -1), out_dtype=jnp.float32,
                     compute_dtype=jnp.float32, tk_max=128))
    ref2 = x2 @ w2.T + b2
    assert jnp.allclose(out2, ref2, atol=1e-4, rtol=1e-4), float(
        jnp.max(jnp.abs(out2 - ref2)))

    print("KERNEL_OK")
</pallas_src>

<mosaic_0001>
module attributes {stable_mosaic.version = 11 : i64} {
  func.func @_kernel_single_k_bias(%arg0: i32, %arg1: i32, %arg2: i32, %arg3: memref<16x128xf32, #tpu.memory_space<vmem>>, %arg4: memref<128x128xf32, #tpu.memory_space<vmem>>, %arg5: memref<1x128xf32, #tpu.memory_space<vmem>>, %arg6: memref<16x128xf32, #tpu.memory_space<vmem>>) attributes {dimension_semantics = [#tpu.dimension_semantics<parallel>, #tpu.dimension_semantics<parallel>, #tpu.dimension_semantics<arbitrary>], iteration_bounds = array<i64: 1, 1, 1>, scalar_prefetch = 0 : i64, scratch_operands = 0 : i64, tpu.core_type = #tpu.core_type<tc>, window_params = [{transform_indices = @transform_0, window_bounds = array<i64: 16, 128>}, {transform_indices = @transform_1, window_bounds = array<i64: 128, 128>}, {transform_indices = @transform_2, window_bounds = array<i64: 1, 128>}, {transform_indices = @transform_3, window_bounds = array<i64: 16, 128>}]} {
    %c0 = arith.constant 0 : index
    %c0_0 = arith.constant 0 : index
    %0 = vector.load %arg3[%c0, %c0_0] : memref<16x128xf32, #tpu.memory_space<vmem>>, vector<16x128xf32>
    %c0_1 = arith.constant 0 : index
    %c0_2 = arith.constant 0 : index
    %1 = vector.load %arg4[%c0_1, %c0_2] : memref<128x128xf32, #tpu.memory_space<vmem>>, vector<128x128xf32>
    %cst = arith.constant dense<0.000000e+00> : vector<16x128xf32>
    %2 = tpu.matmul %0, %1, %cst {dimension_numbers = #tpu.dot_dimension_numbers<[1], [1], [0], [0], [0, 0, 1, 0], [], []>} : vector<16x128xf32>, vector<128x128xf32>, vector<16x128xf32> -> vector<16x128xf32>
    %c0_3 = arith.constant 0 : index
    %c0_4 = arith.constant 0 : index
    %3 = vector.load %arg5[%c0_3, %c0_4] : memref<1x128xf32, #tpu.memory_space<vmem>>, vector<1x128xf32>
    %4 = vector.broadcast %3 : vector<1x128xf32> to vector<16x128xf32>
    %5 = arith.addf %2, %4 : vector<16x128xf32>
    %c0_5 = arith.constant 0 : index
    %c0_6 = arith.constant 0 : index
    %6 = vector.load %arg6[%c0_5, %c0_6] : memref<16x128xf32, #tpu.memory_space<vmem>>, vector<16x128xf32>
    tpu.vector_store %arg6[%c0_5, %c0_6], %5 {strides = array<i32>} : memref<16x128xf32, #tpu.memory_space<vmem>>, vector<16x128xf32>,
    return
  }
  func.func @transform_0(%arg0: i32, %arg1: i32, %arg2: i32) -> (i32, i32) {
    %c0_i32 = arith.constant 0 : i32
    return %arg0, %arg2 : i32, i32
  }
  func.func @transform_1(%arg0: i32, %arg1: i32, %arg2: i32) -> (i32, i32) {
    %c0_i32 = arith.constant 0 : i32
    return %arg1, %arg2 : i32, i32
  }
  func.func @transform_2(%arg0: i32, %arg1: i32, %arg2: i32) -> (i32, i32) {
    %c0_i32 = arith.constant 0 : i32
    %c0_i32_0 = arith.constant 0 : i32
    return %c0_i32, %arg1 : i32, i32
  }
  func.func @transform_3(%arg0: i32, %arg1: i32, %arg2: i32) -> (i32, i32) {
    %c0_i32 = arith.constant 0 : i32
    return %arg0, %arg1 : i32, i32
  }
}

</mosaic_0001>

<bundles_post_ra>
// kernel: meta_linear_forward.1
= control target key start
LH: loop header
LB: loop body
LE: loop exit
PB: predicated region body
PF: predicated region fallthrough
CT: control target
= control target key end

     0   :  { %s165_s1 = inlined_call_operand.vmem [shape: f32[128,128], index: 1, kind: input, shape index: {}]   ;;  %s166_s2 = inlined_call_operand.vmem [shape: f32[1,128], index: 2, kind: input, shape index: {}]   ;;  %s167_s0 = inlined_call_operand.vmem [shape: f32[16,128], index: 0, kind: input, shape index: {}]   ;;  %s168_s3 = inlined_call_operand.vmem [shape: f32[16,128], index: 3, kind: output, shape index: {}]  }
   0x1   :  { %v31_v0 = vld [vmem:[%s165_s1 + $0x78] sm:$0xff]  ;;  %v30_v1 = vld [vmem:[%s165_s1 + $0x70] sm:$0xff]  ;;  %v29_v2 = vld [vmem:[%s165_s1 + $0x68] sm:$0xff] }
   0x2   :  { %36 = vmatpush.xpose.msra.mxu0 %v31_v0  ;;  %65 = vmatpush.xpose.msra.mxu1 %v31_v0  ;;  %v28_v3 = vld [vmem:[%s165_s1 + $0x60] sm:$0xff]  ;;  %v27_v4 = vld [vmem:[%s165_s1 + $0x58] sm:$0xff]  ;;  %v26_v5 = vld [vmem:[%s165_s1 + $0x50] sm:$0xff] }
   0x3   :  { %v25_v6 = vld [vmem:[%s165_s1 + $0x48] sm:$0xff]  ;;  %v24_v7 = vld [vmem:[%s165_s1 + $0x40] sm:$0xff]  ;;  %v23_v8 = vld [vmem:[%s165_s1 + $0x38] sm:$0xff] }
   0x4   :  { %v22_v9 = vld [vmem:[%s165_s1 + $0x30] sm:$0xff]  ;;  %v21_v10 = vld [vmem:[%s165_s1 + $0x28] sm:$0xff]  ;;  %v20_v11 = vld [vmem:[%s165_s1 + $0x20] sm:$0xff] }
   0x5   :  { %v19_v12 = vld [vmem:[%s165_s1 + $0x18] sm:$0xff]  ;;  %v18_v13 = vld [vmem:[%s165_s1 + $0x10] sm:$0xff]  ;;  %v17_v14 = vld [vmem:[%s165_s1 + $0x8] sm:$0xff] }
   0x6   :  { %37 = vmatpush.xpose.msra.mxu0 %v30_v1  ;;  %66 = vmatpush.xpose.msra.mxu1 %v30_v1  ;;  %v16_v15 = vld [vmem:[%s165_s1] sm:$0xff]  ;;  %v15_v17 = vld [vmem:[%s167_s0 + $0x8] sm:$0xff] }
   0x7   :  { %v14_v16 = vld [vmem:[%s167_s0] sm:$0xff] }
   0x8   :  { %v81_v18 = vld [vmem:[%s166_s2] ss:$0 sm:$0xff] }
   0xa   :  { %38 = vmatpush.xpose.msra.mxu0 %v29_v2  ;;  %67 = vmatpush.xpose.msra.mxu1 %v29_v2 }
   0xe   :  { %39 = vmatpush.xpose.msra.mxu0 %v28_v3  ;;  %68 = vmatpush.xpose.msra.mxu1 %v28_v3 }
  0x12   :  { %40 = vmatpush.xpose.msra.mxu0 %v27_v4  ;;  %69 = vmatpush.xpose.msra.mxu1 %v27_v4 }
  0x16   :  { %41 = vmatpush.xpose.msra.mxu0 %v26_v5  ;;  %70 = vmatpush.xpose.msra.mxu1 %v26_v5 }
  0x1a   :  { %42 = vmatpush.xpose.msra.mxu0 %v25_v6  ;;  %71 = vmatpush.xpose.msra.mxu1 %v25_v6 }
  0x1e   :  { %43 = vmatpush.xpose.msra.mxu0 %v24_v7  ;;  %72 = vmatpush.xpose.msra.mxu1 %v24_v7 }
  0x22   :  { %44 = vmatpush.xpose.msra.mxu0 %v23_v8  ;;  %73 = vmatpush.xpose.msra.mxu1 %v23_v8 }
  0x26   :  { %45 = vmatpush.xpose.msra.mxu0 %v22_v9  ;;  %74 = vmatpush.xpose.msra.mxu1 %v22_v9 }
  0x2a   :  { %46 = vmatpush.xpose.msra.mxu0 %v21_v10  ;;  %75 = vmatpush.xpose.msra.mxu1 %v21_v10 }
  0x2e   :  { %47 = vmatpush.xpose.msra.mxu0 %v20_v11  ;;  %76 = vmatpush.xpose.msra.mxu1 %v20_v11 }
  0x32   :  { %48 = vmatpush.xpose.msra.mxu0 %v19_v12  ;;  %77 = vmatpush.xpose.msra.mxu1 %v19_v12 }
  0x36   :  { %49 = vmatpush.xpose.msra.mxu0 %v18_v13  ;;  %78 = vmatpush.xpose.msra.mxu1 %v18_v13 }
  0x3a   :  { %50 = vmatpush.xpose.msra.mxu0 %v17_v14  ;;  %79 = vmatpush.xpose.msra.mxu1 %v17_v14 }
  0x3e   :  { %51 = vmatpush.xpose.msra.mxu0 %v16_v15  ;;  %80 = vmatpush.xpose.msra.mxu1 %v16_v15 }
  0x41   :  { %52 = vmatmul.f32.vlgmr.msra.gmra.mxu0 %v14_v16  ;;  %55 = vmatmul.f32.vlgmr.msra.gmra.mxu1 %v15_v17 }
  0xbe   :  { %v53_v19 = vpop.f32.mrf.mxu0  ;;  %v56_v20 = vpop.f32.mrf.mxu1 }
  0xbf   :  { %v54_v21 = vadd.f32 %v81_v18, %v53_v19  ;;  %v57_v22 = vadd.f32 %v81_v18, %v56_v20 }
  0xc1   :  { %59 = vst [vmem:[%s168_s3] sm:$0xff] %v54_v21 }
  0xc2   :  { %60 = vst [vmem:[%s168_s3 + $0x8] sm:$0xff] %v57_v22 }

</bundles_post_ra>
